<compile_context>
chip_gen: v7x
topology: tpu7x:2x2x1
jax: 0.10.0
libtpu: 0.0.40
codegen_flags: <defaults>
</compile_context>

<pallas_src>
import functools

import jax
import jax.numpy as jnp
from jax.experimental import pallas as pl
from jax.experimental.pallas import tpu as pltpu


def _fusion3_fc_kernel(x1_ref, x2_ref, x3_ref, w_ref, b_ref, o_ref, acc_ref,
                       *, compute_dtype):
    # x*_ref: (tm, tk)      original input dtype (cast in-kernel)
    # w_ref : (3, tk, tn)   compute dtype (stacked, pre-transposed W chunks)
    # b_ref : (1, tn)       float32
    # o_ref : (tm, tn)      output dtype
    # acc_ref: (tm, tn)     float32 VMEM scratch (persists across the K axis)
    k = pl.program_id(2)

    @pl.when(k == 0)
    def _init():
        acc_ref[...] = jnp.zeros_like(acc_ref)

    x1 = x1_ref[...].astype(compute_dtype)
    x2 = x2_ref[...].astype(compute_dtype)
    x3 = x3_ref[...].astype(compute_dtype)
    acc_ref[...] += (
        jnp.dot(x1, w_ref[0], preferred_element_type=jnp.float32)
        + jnp.dot(x2, w_ref[1], preferred_element_type=jnp.float32)
        + jnp.dot(x3, w_ref[2], preferred_element_type=jnp.float32)
    )

    @pl.when(k == pl.num_programs(2) - 1)
    def _finalize():
        o_ref[...] = (acc_ref[...] + b_ref[...].astype(jnp.float32)).astype(o_ref.dtype)


def _round_up(x, m):
    return ((x + m - 1) // m) * m


def _vmem_capacity_bytes():
    """Per-core VMEM capacity; conservative 64 MiB fallback (safe on v7x)."""
    try:
        info = pltpu.get_tpu_info()
        cap = getattr(info, "vmem_capacity_bytes", None)
        if cap:
            return int(cap)
    except Exception:
        pass
    return 64 * 1024 * 1024


def prepare_fusion3_params(W, b, *, compute_dtype=jnp.bfloat16):
    """One-time parameter transform (cache/hoist this out of the forward path).

    W: (D, 3*D) PyTorch nn.Linear layout (out_features, in_features); b: (D,).
    Returns Ws: (3, D, D) with Ws[k, i, o] = W[o, k*D + i] (so x_k @ Ws[k]),
    and b2d: (1, D) float32.
    """
    D = b.shape[0]
    assert W.shape == (D, 3 * D)
    Ws = jnp.transpose(W.reshape(D, 3, D), (1, 2, 0)).astype(compute_dtype)
    b2d = b.reshape(1, D).astype(jnp.float32)
    return Ws, b2d


def fusion3_fc_prepared(x1, x2, x3, Ws, b2d, *, tile_m=256):
    """Pallas equivalent of Fusion3_FCLayer.forward using prepared params."""
    D = x1.shape[-1]
    assert x1.shape == x2.shape == x3.shape
    assert Ws.shape == (3, D, D)
    assert b2d.shape == (1, D)

    compute_dtype = Ws.dtype
    out_dtype = x1.dtype
    lead_shape = x1.shape[:-1]
    M = 1
    for s in lead_shape:
        M *= int(s)

    in_bytes = jnp.dtype(x1.dtype).itemsize
    cbytes = jnp.dtype(compute_dtype).itemsize
    obytes = jnp.dtype(out_dtype).itemsize
    sub = 8 if (in_bytes >= 4 and obytes >= 4) else 16

    cap = _vmem_capacity_bytes()
    budget = (7 * cap) // 10          # tile-sizing budget (~70% of capacity)
    vmem_limit = (4 * cap) // 5       # explicit scoped-VMEM limit (~80%)

    # Row tile: keep it large (amortizes weight streaming), sublane-aligned.
    tm = max(sub, min(int(tile_m), _round_up(M, sub)))
    tm = (tm // sub) * sub

    # Candidate K / N tiles: full D preferred, else 128-multiples dividing D.
    cands = [D] + [c for c in (512, 256, 128) if D % c == 0 and c < D]

    def vmem_est(tm_, tk_, tn_):
        ins = 3 * tm_ * tk_ * in_bytes + 3 * tk_ * tn_ * cbytes + tn_ * 4
        outs = tm_ * tn_ * obytes
        return 2 * (ins + outs) + tm_ * tn_ * 4  # double-buffered I/O + scratch

    tk = tn = None
    for tn_ in cands:            # prefer tn == D (weight stays fully resident)
        for tk_ in cands:        # shrink K before N when the weight is too big
            if vmem_est(tm, tk_, tn_) <= budget:
                tk, tn = tk_, tn_
                break
        if tk is not None:
            break
    if tk is None:
        tk, tn = cands[-1], cands[-1]
        while tm > sub and vmem_est(tm, tk, tn) > budget:
            tm = max(sub, ((tm // 2) // sub) * sub)
    # TODO(synk): if D is huge AND not a multiple of 128 (tk == tn == D forced),
    # the weight block may still exceed VMEM; would need masked K-tail tiling.

    m_tiles = pl.cdiv(M, tm)
    n_tiles = D // tn
    k_tiles = D // tk

    x1f = x1.reshape(M, D)
    x2f = x2.reshape(M, D)
    x3f = x3.reshape(M, D)

    # Grid order: N outermost, M middle, K (reduction) innermost.
    x_spec = pl.BlockSpec((tm, tk), lambda j, i, k: (i, k))
    w_spec = pl.BlockSpec((3, tk, tn), lambda j, i, k: (0, k, j))
    b_spec = pl.BlockSpec((1, tn), lambda j, i, k: (0, j))
    o_spec = pl.BlockSpec((tm, tn), lambda j, i, k: (i, j))

    cost = pl.CostEstimate(
        flops=2 * M * 3 * D * D,
        transcendentals=0,
        bytes_accessed=(3 * M * D * in_bytes + 3 * D * D * cbytes
                        + D * 4 + M * D * obytes),
    )

    kernel = functools.partial(_fusion3_fc_kernel, compute_dtype=compute_dtype)

    out_flat = pl.pallas_call(
        kernel,
        out_shape=jax.ShapeDtypeStruct((M, D), out_dtype),
        grid_spec=pltpu.PrefetchScalarGridSpec(
            num_scalar_prefetch=0,
            grid=(n_tiles, m_tiles, k_tiles),
            in_specs=[x_spec, x_spec, x_spec, w_spec, b_spec],
            out_specs=o_spec,
            scratch_shapes=[pltpu.VMEM((tm, tn), jnp.float32)],
        ),
        compiler_params=pltpu.CompilerParams(
            dimension_semantics=("parallel", "parallel", "arbitrary"),
            vmem_limit_bytes=vmem_limit,
        ),
        cost_estimate=cost,
    )(x1f, x2f, x3f, Ws, b2d)

    return out_flat.reshape(*lead_shape, D)


def fusion3_fc(x1, x2, x3, W, b, *, compute_dtype=jnp.bfloat16, tile_m=256):
    """Convenience one-shot wrapper.

    For repeated forward calls, call prepare_fusion3_params() once at param
    init and use fusion3_fc_prepared() so the W restack isn't redone per call.
    """
    Ws, b2d = prepare_fusion3_params(W, b, compute_dtype=compute_dtype)
    return fusion3_fc_prepared(x1, x2, x3, Ws, b2d, tile_m=tile_m)


if __name__ == "__main__":
    key = jax.random.PRNGKey(0)
    batch, seq, hidden = 2, 8, 32

    k1, k2, k3, kw, kb = jax.random.split(key, 5)
    x1 = jax.random.normal(k1, (batch, seq, hidden), dtype=jnp.float32)
    x2 = jax.random.normal(k2, (batch, seq, hidden), dtype=jnp.float32)
    x3 = jax.random.normal(k3, (batch, seq, hidden), dtype=jnp.float32)

    # Deterministic Linear(3*hidden -> hidden) params (PyTorch layout).
    bound = 1.0 / (3.0 * hidden) ** 0.5
    W = jax.random.uniform(kw, (hidden, 3 * hidden), dtype=jnp.float32,
                           minval=-bound, maxval=bound)
    b = jax.random.uniform(kb, (hidden,), dtype=jnp.float32,
                           minval=-bound, maxval=bound)

    # Reference: concat + matmul (original module semantics).
    ref = jnp.concatenate([x1, x2, x3], axis=-1) @ W.T + b

    # High-precision path: f32 compute, params prepared once (hoisted).
    Ws32, b2d32 = prepare_fusion3_params(W, b, compute_dtype=jnp.float32)
    out_f32 = jax.block_until_ready(fusion3_fc_prepared(x1, x2, x3, Ws32, b2d32))
    assert out_f32.shape == (batch, seq, hidden)
    assert jnp.allclose(out_f32, ref, atol=1e-3, rtol=1e-3)

    # Fast path: bf16 operands, f32 accumulation (looser tolerance).
    out_bf16 = jax.block_until_ready(
        fusion3_fc(x1, x2, x3, W, b, compute_dtype=jnp.bfloat16))
    assert out_bf16.shape == (batch, seq, hidden)
    assert jnp.allclose(out_bf16, ref, atol=5e-2, rtol=5e-2)

    print("KERNEL_OK")
</pallas_src>

<mosaic_0001>
module attributes {stable_mosaic.version = 11 : i64} {
  func.func @_fusion3_fc_kernel(%arg0: i32, %arg1: i32, %arg2: i32, %arg3: memref<16x32xf32, #tpu.memory_space<vmem>>, %arg4: memref<16x32xf32, #tpu.memory_space<vmem>>, %arg5: memref<16x32xf32, #tpu.memory_space<vmem>>, %arg6: memref<3x32x32xf32, #tpu.memory_space<vmem>>, %arg7: memref<1x32xf32, #tpu.memory_space<vmem>>, %arg8: memref<16x32xf32, #tpu.memory_space<vmem>>, %arg9: memref<16x32xf32, #tpu.memory_space<vmem>>) attributes {dimension_semantics = [#tpu.dimension_semantics<parallel>, #tpu.dimension_semantics<parallel>, #tpu.dimension_semantics<arbitrary>], iteration_bounds = array<i64: 1, 1, 1>, scalar_prefetch = 0 : i64, scratch_operands = 1 : i64, tpu.core_type = #tpu.core_type<tc>, window_params = [{transform_indices = @transform_0, window_bounds = array<i64: 16, 32>}, {transform_indices = @transform_1, window_bounds = array<i64: 16, 32>}, {transform_indices = @transform_2, window_bounds = array<i64: 16, 32>}, {transform_indices = @transform_3, window_bounds = array<i64: 3, 32, 32>}, {transform_indices = @transform_4, window_bounds = array<i64: 1, 32>}, {transform_indices = @transform_5, window_bounds = array<i64: 16, 32>}]} {
    %c0_i32 = arith.constant 0 : i32
    %0 = arith.cmpi eq, %arg2, %c0_i32 : i32
    %1 = arith.extui %0 : i1 to i32
    %c0_i32_0 = arith.constant 0 : i32
    %2 = arith.cmpi ne, %1, %c0_i32_0 : i32
    scf.if %2 {
      %cst_21 = arith.constant 0.000000e+00 : f32
      %23 = vector.broadcast %cst_21 : f32 to vector<16x32xf32>
      %c0_22 = arith.constant 0 : index
      %c0_23 = arith.constant 0 : index
      %24 = vector.load %arg9[%c0_22, %c0_23] : memref<16x32xf32, #tpu.memory_space<vmem>>, vector<16x32xf32>
      tpu.vector_store %arg9[%c0_22, %c0_23], %23 {strides = array<i32>} : memref<16x32xf32, #tpu.memory_space<vmem>>, vector<16x32xf32>,
    } else {
    }
    %c0 = arith.constant 0 : index
    %c0_1 = arith.constant 0 : index
    %3 = vector.load %arg3[%c0, %c0_1] : memref<16x32xf32, #tpu.memory_space<vmem>>, vector<16x32xf32>
    %c0_2 = arith.constant 0 : index
    %c0_3 = arith.constant 0 : index
    %4 = vector.load %arg4[%c0_2, %c0_3] : memref<16x32xf32, #tpu.memory_space<vmem>>, vector<16x32xf32>
    %c0_4 = arith.constant 0 : index
    %c0_5 = arith.constant 0 : index
    %5 = vector.load %arg5[%c0_4, %c0_5] : memref<16x32xf32, #tpu.memory_space<vmem>>, vector<16x32xf32>
    %c0_6 = arith.constant 0 : index
    %c0_7 = arith.constant 0 : index
    %6 = vector.load %arg9[%c0_6, %c0_7] : memref<16x32xf32, #tpu.memory_space<vmem>>, vector<16x32xf32>
    %c0_8 = arith.constant 0 : index
    %c0_9 = arith.constant 0 : index
    %c0_10 = arith.constant 0 : index
    %7 = vector.load %arg6[%c0_8, %c0_9, %c0_10] : memref<3x32x32xf32, #tpu.memory_space<vmem>>, vector<1x32x32xf32>
    %8 = vector.shape_cast %7 : vector<1x32x32xf32> to vector<32x32xf32>
    %cst = arith.constant dense<0.000000e+00> : vector<16x32xf32>
    %9 = tpu.matmul %3, %8, %cst {dimension_numbers = #tpu.dot_dimension_numbers<[1], [0], [0], [1], [0, 0, 1, 1], [], []>} : vector<16x32xf32>, vector<32x32xf32>, vector<16x32xf32> -> vector<16x32xf32>
    %c1 = arith.constant 1 : index
    %c0_11 = arith.constant 0 : index
    %c0_12 = arith.constant 0 : index
    %10 = vector.load %arg6[%c1, %c0_11, %c0_12] : memref<3x32x32xf32, #tpu.memory_space<vmem>>, vector<1x32x32xf32>
    %11 = vector.shape_cast %10 : vector<1x32x32xf32> to vector<32x32xf32>
    %cst_13 = arith.constant dense<0.000000e+00> : vector<16x32xf32>
    %12 = tpu.matmul %4, %11, %cst_13 {dimension_numbers = #tpu.dot_dimension_numbers<[1], [0], [0], [1], [0, 0, 1, 1], [], []>} : vector<16x32xf32>, vector<32x32xf32>, vector<16x32xf32> -> vector<16x32xf32>
    %13 = arith.addf %9, %12 : vector<16x32xf32>
    %c2 = arith.constant 2 : index
    %c0_14 = arith.constant 0 : index
    %c0_15 = arith.constant 0 : index
    %14 = vector.load %arg6[%c2, %c0_14, %c0_15] : memref<3x32x32xf32, #tpu.memory_space<vmem>>, vector<1x32x32xf32>
    %15 = vector.shape_cast %14 : vector<1x32x32xf32> to vector<32x32xf32>
    %cst_16 = arith.constant dense<0.000000e+00> : vector<16x32xf32>
    %16 = tpu.matmul %5, %15, %cst_16 {dimension_numbers = #tpu.dot_dimension_numbers<[1], [0], [0], [1], [0, 0, 1, 1], [], []>} : vector<16x32xf32>, vector<32x32xf32>, vector<16x32xf32> -> vector<16x32xf32>
    %17 = arith.addf %13, %16 : vector<16x32xf32>
    %18 = arith.addf %6, %17 : vector<16x32xf32>
    %c0_17 = arith.constant 0 : index
    %c0_18 = arith.constant 0 : index
    %19 = vector.load %arg9[%c0_17, %c0_18] : memref<16x32xf32, #tpu.memory_space<vmem>>, vector<16x32xf32>
    tpu.vector_store %arg9[%c0_17, %c0_18], %18 {strides = array<i32>} : memref<16x32xf32, #tpu.memory_space<vmem>>, vector<16x32xf32>,
    %c0_i32_19 = arith.constant 0 : i32
    %20 = arith.cmpi eq, %arg2, %c0_i32_19 : i32
    %21 = arith.extui %20 : i1 to i32
    %c0_i32_20 = arith.constant 0 : i32
    %22 = arith.cmpi ne, %21, %c0_i32_20 : i32
    scf.if %22 {
      %c0_21 = arith.constant 0 : index
      %c0_22 = arith.constant 0 : index
      %23 = vector.load %arg9[%c0_21, %c0_22] : memref<16x32xf32, #tpu.memory_space<vmem>>, vector<16x32xf32>
      %c0_23 = arith.constant 0 : index
      %c0_24 = arith.constant 0 : index
      %24 = vector.load %arg7[%c0_23, %c0_24] : memref<1x32xf32, #tpu.memory_space<vmem>>, vector<1x32xf32>
      %25 = vector.broadcast %24 : vector<1x32xf32> to vector<16x32xf32>
      %26 = arith.addf %23, %25 : vector<16x32xf32>
      %c0_25 = arith.constant 0 : index
      %c0_26 = arith.constant 0 : index
      %27 = vector.load %arg8[%c0_25, %c0_26] : memref<16x32xf32, #tpu.memory_space<vmem>>, vector<16x32xf32>
      tpu.vector_store %arg8[%c0_25, %c0_26], %26 {strides = array<i32>} : memref<16x32xf32, #tpu.memory_space<vmem>>, vector<16x32xf32>,
    } else {
    }
    return
  }
  func.func @transform_0(%arg0: i32, %arg1: i32, %arg2: i32) -> (i32, i32) {
    %c0_i32 = arith.constant 0 : i32
    return %arg1, %arg2 : i32, i32
  }
  func.func @transform_1(%arg0: i32, %arg1: i32, %arg2: i32) -> (i32, i32) {
    %c0_i32 = arith.constant 0 : i32
    return %arg1, %arg2 : i32, i32
  }
  func.func @transform_2(%arg0: i32, %arg1: i32, %arg2: i32) -> (i32, i32) {
    %c0_i32 = arith.constant 0 : i32
    return %arg1, %arg2 : i32, i32
  }
  func.func @transform_3(%arg0: i32, %arg1: i32, %arg2: i32) -> (i32, i32, i32) {
    %c0_i32 = arith.constant 0 : i32
    %c0_i32_0 = arith.constant 0 : i32
    return %c0_i32, %arg2, %arg0 : i32, i32, i32
  }
  func.func @transform_4(%arg0: i32, %arg1: i32, %arg2: i32) -> (i32, i32) {
    %c0_i32 = arith.constant 0 : i32
    %c0_i32_0 = arith.constant 0 : i32
    return %c0_i32, %arg0 : i32, i32
  }
  func.func @transform_5(%arg0: i32, %arg1: i32, %arg2: i32) -> (i32, i32) {
    %c0_i32 = arith.constant 0 : i32
    return %arg1, %arg0 : i32, i32
  }
}

</mosaic_0001>

<bundles_post_ra>
// kernel: tpu_custom_call.1
= control target key start
LH: loop header
LB: loop body
LE: loop exit
PB: predicated region body
PF: predicated region fallthrough
CT: control target
= control target key end

     0   :  { %10 = vsyncpa [#allocation4], 0  ;;  %s744_s0 = inlined_call_operand.hbm [shape: f32[16,32], index: 0, kind: input, shape index: {}]   ;;  %s745_s1 = inlined_call_operand.hbm [shape: f32[16,32], index: 1, kind: input, shape index: {}]   ;;  %s746_s2 = inlined_call_operand.hbm [shape: f32[16,32], index: 2, kind: input, shape index: {}]   ;;  %s747_s3 = inlined_call_operand.hbm [shape: f32[3,32,32], index: 3, kind: input, shape index: {}]   ;;  %s748_s4 = inlined_call_operand.vmem [shape: f32[1,32], index: 4, kind: input, shape index: {}]   ;;  %s749_s5 = inlined_call_operand.hbm [shape: f32[16,32], index: 5, kind: output, shape index: {}]  }
   0x1   :  { %11 = vsyncpa [#allocation7], 0 }
   0x2   :  { %12 = vsyncpa [#allocation10], 0 }
   0x3   :  { %13 = vsyncpa [#allocation5], 0  ;;  %s602_s18 = smov [#allocation6]   ;;  %s603_s20 = smov [#allocation3]  }
   0x4   :  { %s31_s19 = sshll.u32 %s602_s18, 4  ;;  %s19_s21 = sshll.u32 %s603_s20, 4  ;;  %s32_s19 = int_to_ptr.vmem [resolvable:$true] %s31_s19  ;;  %s640_s21 = int_to_ptr.vmem [resolvable:$true] %s19_s21 }
   0x5   :  { %s484_s24 = scalar_lea.hbm %s745_s1, 256 }
   0x6   :  { %p485_p0 = scmp.ne.s32.totalorder %s745_s1, %s484_s24  ;;  %p488_p1 = scmp.lt.u32.totalorder %s484_s24, %s745_s1 }
   0x8   :  { %p490_p2 = pnand %p488_p1, %p485_p0 }
   0xa   :  { %493 = shalt.err (!%p490_p2)
}
   0xb   :  { %s494_s29 = scalar_lea.vmem %s32_s19, 256  ;;  %p499_p4 = scmp.lt.s32.totalorder %s32_s19, %s32_s19 }
   0xc   :  { %p495_p3 = scmp.ne.s32.totalorder %s32_s19, %s494_s29  ;;  %p500_p5 = scmp.lt.s32.totalorder %s494_s29, %s494_s29 }
   0xe   :  { %p501_p6 = por %p500_p5, %p499_p4 }
  0x10   :  { %p502_p7 = pnand %p501_p6, %p495_p3 }
  0x12   :  { %505 = shalt.err (!%p502_p7)
}
  0x13   :  { %s604_s30 = smov 128   ;;  %s605_s6 = smov 8  }
  0x14   :  { %37 = dma.hbm_to_vmem [thread:$0]  %s745_s1, 256, %s32_s19, [#allocation7], %s604_s30, %s604_s30, %s605_s6  }
  0x15   :  { %s506_s11 = scalar_lea.hbm %s744_s0, 256 }
  0x16   :  { %p507_p8 = scmp.ne.s32.totalorder %s744_s0, %s506_s11  ;;  %p510_p9 = scmp.lt.u32.totalorder %s506_s11, %s744_s0 }
  0x18   :  { %p512_p10 = pnand %p510_p9, %p507_p8 }
  0x1a   :  { %515 = shalt.err (!%p512_p10)
}
  0x1b   :  { %s516_s16 = scalar_lea.vmem %s640_s21, 256  ;;  %p521_p12 = scmp.lt.s32.totalorder %s640_s21, %s640_s21 }
  0x1c   :  { %p517_p11 = scmp.ne.s32.totalorder %s640_s21, %s516_s16  ;;  %p522_p13 = scmp.lt.s32.totalorder %s516_s16, %s516_s16 }
  0x1e   :  { %p523_p0 = por %p522_p13, %p521_p12 }
  0x20   :  { %p524_p1 = pnand %p523_p0, %p517_p11 }
  0x22   :  { %527 = shalt.err (!%p524_p1)
}
  0x23   :  { %25 = dma.hbm_to_vmem [thread:$0]  %s744_s0, 256, %s640_s21, [#allocation4], %s604_s30, %s604_s30, %s605_s6  }
  0x24   :  { %s606_s18 = smov [#allocation8]   ;;  %s607_s20 = smov [#allocation9]  }
  0x25   :  { %s43_s19 = sshll.u32 %s606_s18, 4  ;;  %s55_s22 = sshll.u32 %s607_s20, 4  ;;  %s44_s19 = int_to_ptr.vmem [resolvable:$true] %s43_s19  ;;  %s677_s22 = int_to_ptr.vmem [resolvable:$true] %s55_s22 }
  0x26   :  { %s528_s25 = scalar_lea.hbm %s746_s2, 256 }
  0x27   :  { %p529_p2 = scmp.ne.s32.totalorder %s746_s2, %s528_s25  ;;  %p532_p3 = scmp.lt.u32.totalorder %s528_s25, %s746_s2 }
  0x29   :  { %p534_p4 = pnand %p532_p3, %p529_p2 }
  0x2b   :  { %537 = shalt.err (!%p534_p4)
}
  0x2c   :  { %s538_s0 = scalar_lea.vmem %s44_s19, 256  ;;  %p543_p6 = scmp.lt.s32.totalorder %s44_s19, %s44_s19 }
  0x2d   :  { %p539_p5 = scmp.ne.s32.totalorder %s44_s19, %s538_s0  ;;  %p544_p7 = scmp.lt.s32.totalorder %s538_s0, %s538_s0 }
  0x2f   :  { %p545_p8 = por %p544_p7, %p543_p6 }
  0x31   :  { %p546_p9 = pnand %p545_p8, %p539_p5 }
  0x33   :  { %549 = shalt.err (!%p546_p9)
}
  0x34   :  { %49 = dma.hbm_to_vmem [thread:$0]  %s746_s2, 256, %s44_s19, [#allocation7], %s604_s30, %s604_s30, %s605_s6  }
  0x35   :  { %s550_s10 = scalar_lea.hbm %s747_s3, 1536 }
  0x36   :  { %p551_p10 = scmp.ne.s32.totalorder %s747_s3, %s550_s10  ;;  %p554_p11 = scmp.lt.u32.totalorder %s550_s10, %s747_s3 }
  0x38   :  { %p556_p12 = pnand %p554_p11, %p551_p10 }
  0x3a   :  { %559 = shalt.err (!%p556_p12)
}
  0x3b   :  { %s560_s15 = scalar_lea.vmem %s677_s22, 1536  ;;  %p565_p0 = scmp.lt.s32.totalorder %s677_s22, %s677_s22 }
  0x3c   :  { %p561_p13 = scmp.ne.s32.totalorder %s677_s22, %s560_s15  ;;  %p566_p1 = scmp.lt.s32.totalorder %s560_s15, %s560_s15 }
  0x3e   :  { %p567_p2 = por %p566_p1, %p565_p0 }
  0x40   :  { %p568_p3 = pnand %p567_p2, %p561_p13 }
  0x42   :  { %571 = shalt.err (!%p568_p3)
}
  0x43   :  { %61 = dma.hbm_to_vmem [thread:$0]  %s747_s3, 1536, %s677_s22, [#allocation10], %s604_s30, %s604_s30, %s605_s6  }
  0x44   :  { %594 = dma.done.wait [#allocation4], 256  }
  0x45   :  { %595 = vsyncadd [#allocation4], 4294967040 }
  0x46   :  { %596 = dma.done.wait [#allocation7], 512  }
  0x47   :  { %597 = vsyncadd [#allocation7], 4294966784 }
  0x48   :  { %598 = dma.done.wait [#allocation10], 1536  }
  0x49   :  { %599 = vsyncadd [#allocation10], 4294965760  ;;  %vm80_vm0 = vcmask 261120   ;;  %v91_v0 = vld [vmem:[#allocation9] sm:$0xff]  ;;  %v92_v1 = vld [vmem:[#allocation9 + $0x8] sm:$0xff]  ;;  %v608_v24 = vmov 0.0  }
  0x4a   :  { %v93_v2 = vld [vmem:[#allocation9 + $0x10] sm:$0xff]  ;;  %v456_v3 = vpack.c.bf16 %v92_v1, %v91_v0  ;;  %v94_v4 = vld [vmem:[#allocation9 + $0x18] sm:$0xff]  ;;  %v96_v6 = vld [vmem:[#allocation9 + $0x20] sm:$0xff]  ;;  %82 = vst.msk [vmem:[#allocation2 + $0x8] sm:$0xff] %vm80_vm0, %v608_v24  ;;  %s609_s17 = smov [#allocation11]  }
  0x4b   :  { %v83_v5 = vld [vmem:[#allocation3] sm:$0xff]  ;;  %v460_v7 = vpack.c.bf16 %v94_v4, %v93_v2  ;;  %v97_v8 = vld [vmem:[#allocation9 + $0x28] sm:$0xff]  ;;  %v264_v9 = vld [vmem:[#allocation9 + $0x40] sm:$0xff]  ;;  %81 = vst.msk [vmem:[#allocation2] sm:$0xff] %vm80_vm0, %v608_v24  ;;  %s376_s18 = sshll.u32 %s609_s17, 4  ;;  %s377_s18 = int_to_ptr.vmem [resolvable:$true] %s376_s18 }
  0x4c   :  { %434 = vmatprep.mubr.msk.f32.mxu0 %vm80_vm0, %v83_v5  ;;  %457 = vmatprep.subr.bf16.mxu0 %v456_v3  ;;  %v448_v10 = vpack.c.bf16 %v97_v8, %v96_v6  ;;  %v265_v11 = vld [vmem:[#allocation9 + $0x48] sm:$0xff]  ;;  %v98_v12 = vld [vmem:[#allocation9 + $0x30] sm:$0xff]  ;;  %v99_v13 = vld [vmem:[#allocation9 + $0x38] sm:$0xff]  ;;  %s572_s19 = scalar_lea.vmem %s377_s18, 256  ;;  %p577_p5 = scmp.lt.s32.totalorder %s377_s18, %s377_s18 }
  0x4d   :  { %459 = vmatpush3.bf16.msra.mxu0 %v456_v3  ;;  %v452_v14 = vpack.c.bf16 %v99_v13, %v98_v12  ;;  %v85_v15 = vld [vmem:[#allocation6] sm:$0xff]  ;;  %v464_v16 = vpack.c.bf16 %v265_v11, %v264_v9  ;;  %v266_v17 = vld [vmem:[#allocation9 + $0x50] sm:$0xff]  ;;  %v267_v18 = vld [vmem:[#allocation9 + $0x58] sm:$0xff]  ;;  %p573_p4 = scmp.ne.s32.totalorder %s377_s18, %s572_s19  ;;  %p578_p6 = scmp.lt.s32.totalorder %s572_s19, %s572_s19 }
  0x4e   :  { %461 = vmatprep.subr.bf16.mxu0 %v460_v7  ;;  %449 = vmatprep.subr.bf16.mxu1 %v448_v10  ;;  %v84_v19 = vld [vmem:[#allocation3 + $0x8] sm:$0xff]  ;;  %v468_v20 = vpack.c.bf16 %v267_v18, %v266_v17  ;;  %v87_v21 = vld [vmem:[#allocation8] sm:$0xff]  ;;  %v86_v22 = vld [vmem:[#allocation6 + $0x8] sm:$0xff] }
  0x4f   :  { %451 = vmatpush3.bf16.msra.mxu1 %v448_v10  ;;  %423 = vmatprep.mubr.msk.f32.mxu1 %vm80_vm0, %v85_v15  ;;  %v88_v23 = vld [vmem:[#allocation8 + $0x8] sm:$0xff]  ;;  %v396_v35 = vld [vmem:[%s748_s4] ss:$0 sm:$0xff]  ;;  %p579_p7 = por %p578_p6, %p577_p5 }
  0x50   :  { %453 = vmatprep.subr.bf16.mxu1 %v452_v14 }
  0x51   :  { %463 = vmatpush3.bf16.msra.mxu0 %v460_v7  ;;  %v90_v27 = vld [vmem:[#allocation2 + $0x8] sm:$0xff]  ;;  %p580_p8 = pnand %p579_p7, %p573_p4 }
  0x52   :  { %465 = vmatprep.subr.bf16.mxu0 %v464_v16  ;;  %v89_v30 = vld [vmem:[#allocation2] sm:$0xff] }
  0x53   :  { %455 = vmatpush3.bf16.msra.mxu1 %v452_v14 }
  0x54   :  { %435 = vmatmul.mubr.msk.f32.vlgmr.msra.gmra.mrb[0].mxu0 %vm80_vm0, %v84_v19 }
  0x55   :  { %467 = vmatpush3.bf16.msra.mxu0 %v464_v16  ;;  %445 = vmatprep.mubr.msk.f32.mxu0 %vm80_vm0, %v87_v21 }
  0x56   :  { %469 = vmatprep.subr.bf16.mxu0 %v468_v20  ;;  %424 = vmatmul.mubr.msk.f32.vlgmr.msra.gmra.mrb[0].mxu1 %vm80_vm0, %v86_v22 }
  0x59   :  { %471 = vmatpush3.bf16.msra.mxu0 %v468_v20 }
  0x5c   :  { %446 = vmatmul.mubr.msk.f32.vlgmr.msra.gmra.mrb[0].mxu0 %vm80_vm0, %v88_v23 }
 0x129   :  { %v425_v25 = vpop.f32.mrb[0].mxu1 }
 0x12a   :  { %v173_v26 = vpop.f32.mrb[1].mxu1 }
 0x12f   :  { %v447_v28 = vpop.f32.mrb[0].mxu0 }
 0x130   :  { %v472_v29 = vadd.f32 %v447_v28, %v425_v25  ;;  %v340_v31 = vpop.f32.mrb[1].mxu0 }
 0x131   :  { %v473_v32 = vadd.f32 %v340_v31, %v173_v26 }
 0x132   :  { %v352_v33 = vadd.f32 %v472_v29, %v90_v27 }
 0x133   :  { %v351_v34 = vadd.f32 %v473_v32, %v89_v30 }
 0x134   :  { %354 = vst.msk [vmem:[#allocation2 + $0x8] sm:$0xff] %vm80_vm0, %v352_v33 }
 0x135   :  { %353 = vst.msk [vmem:[#allocation2] sm:$0xff] %vm80_vm0, %v351_v34 }
 0x13b   :  { %v359_v36 = vld [vmem:[#allocation2 + $0x8] sm:$0xff] }
 0x13c   :  { %v358_v37 = vld [vmem:[#allocation2] sm:$0xff]  ;;  %v368_v38 = vadd.f32 %v396_v35, %v359_v36 }
 0x13d   :  { %v367_v39 = vadd.f32 %v396_v35, %v358_v37 }
 0x13e   :  { %370 = vst.msk [vmem:[#allocation11 + $0x8] sm:$0xff] %vm80_vm0, %v368_v38 }
 0x13f   :  { %369 = vst.msk [vmem:[#allocation11] sm:$0xff] %vm80_vm0, %v367_v39 }
 0x140   :  { %583 = shalt.err (!%p580_p8)
}
 0x141   :  { %s584_s22 = scalar_lea.hbm %s749_s5, 256 }
 0x142   :  { %p585_p9 = scmp.ne.s32.totalorder %s749_s5, %s584_s22  ;;  %p588_p10 = scmp.lt.u32.totalorder %s584_s22, %s749_s5 }
 0x144   :  { %p590_p11 = pnand %p588_p10, %p585_p9 }
 0x146   :  { %593 = shalt.err (!%p590_p11)
}
 0x147   :  { %382 = dma.vmem_to_hbm [thread:$0]  %s377_s18, 256, %s749_s5, [#allocation5], %s604_s30, %s604_s30, %s605_s6  }
 0x148   :  { %600 = dma.done.wait [#allocation5], 256  }
 0x149   :  { %601 = vsyncadd [#allocation5], 4294967040 }
 0x14a   :  { %386 = vsyncpa [#allocation4], 1 }
 0x14b   :  { %387 = vsyncpa [#allocation7], 1 }
 0x14c   :  { %388 = vsyncpa [#allocation10], 1 }
 0x14d   :  { %389 = vsyncpa [#allocation5], 1 }

</bundles_post_ra>
